<compile_context>
chip_gen: v5e
topology: v5e:2x2
jax: 0.10.0
libtpu: 0.0.40
codegen_flags: <defaults>
</compile_context>

<pallas_src>
import numpy as np
import jax
import jax.numpy as jnp
from jax import lax
from jax.experimental import pallas as pl
from jax.experimental.pallas import tpu as pltpu

_LANES = 128
_SUBLANES = 8
_TILE_BYTES = 2 * 1024 * 1024   # per-buffer block budget; ~4x with in+out double-buffering
_MIN_GRID_STEPS = 2             # give v7x's two TensorCores something to split

# lowbias32-style integer hash expressed entirely in int32 so Mosaic lowers it
# to plain VPU xor / shift / mul ops (logical shift == arithmetic shift + mask).
_M1 = np.int32(0x7FEB352D)
_M2 = np.int32(0x846CA68B - (1 << 32))
_SEED_MIX = np.int32(0x27D4EB2F)


def _hash_i32(x):
    x = x ^ ((x >> 16) & 0xFFFF)
    x = x * _M1
    x = x ^ ((x >> 15) & 0x1FFFF)
    x = x * _M2
    x = x ^ ((x >> 16) & 0xFFFF)
    return x


def _keep_threshold_i32(p_drop):
    # Hash bits are uniform over int32; keep <=> bits > thr gives
    # P(keep) = 1 - p_drop to within 2^-32 (same statistics as uniform > p).
    thr = int(round(float(p_drop) * (1 << 32))) - (1 << 31) - 1
    thr = max(-(1 << 31), min((1 << 31) - 1, thr))
    return np.int32(thr)


def _make_rowwise_kernel(p_drop, row_tile):
    """x viewed as (B*T, H): one row == one timestep.

    The hash runs on a (row_tile, 1) column (one draw per timestep) and the
    keep decision is broadcast across the H lanes by the select, so per-element
    VALU cost is ~2 ops regardless of the hash length.
    """
    thr = _keep_threshold_i32(p_drop)

    def kernel(seed_ref, x_ref, o_ref):
        i = pl.program_id(0)
        t = lax.broadcasted_iota(jnp.int32, (row_tile, 1), 0) + i * row_tile
        bits = _hash_i32(t + seed_ref[0] * _SEED_MIX)
        keep = bits > thr                            # (row_tile, 1), broadcast over H
        x = x_ref[...]
        o_ref[...] = jnp.where(keep, x, jnp.zeros_like(x))

    return kernel


def _make_packed_kernel(p_drop, feat_h, row_tile):
    """x viewed lane-dense as (B*T*H // 128, 128), for narrow H (< 128).

    Every load/store uses all 128 lanes (no masked vst).  Each element maps to
    its timestep via an overflow-safe decomposition of flat_index // H so the
    whole-timestep-drop guarantee holds even for >2^31-element tensors.
    """
    thr = _keep_threshold_i32(p_drop)
    h = int(feat_h)
    h_is_pow2 = (h & (h - 1)) == 0
    h_shift = h.bit_length() - 1

    def kernel(seed_ref, x_ref, o_ref):
        i = pl.program_id(0)
        r = lax.broadcasted_iota(jnp.int32, (row_tile, _LANES), 0)
        l = lax.broadcasted_iota(jnp.int32, (row_tile, _LANES), 1)
        gr = i * row_tile + r                        # global packed-row index
        # flat = gr*128 + l = (q*h + rem)*128 + l  =>  t = q*128 + (rem*128+l)//h
        if h_is_pow2:                                # shifts / ands only
            q = gr >> h_shift
            rem = gr & (h - 1)
            t = q * _LANES + ((rem * _LANES + l) >> h_shift)
        else:
            q = gr // h
            rem = gr - q * h
            t = q * _LANES + (rem * _LANES + l) // h
        bits = _hash_i32(t + seed_ref[0] * _SEED_MIX)
        keep = bits > thr
        x = x_ref[...]
        o_ref[...] = jnp.where(keep, x, jnp.zeros_like(x))

    return kernel


def _row_tiling(n_rows, width, itemsize):
    """Byte-budget row tile (multiple of 8), with >=2 grid steps when possible."""
    budget = (_TILE_BYTES // (width * itemsize)) // _SUBLANES * _SUBLANES
    budget = max(_SUBLANES, budget)
    if n_rows >= _MIN_GRID_STEPS * _SUBLANES:
        half = max(_SUBLANES, (n_rows // _MIN_GRID_STEPS) // _SUBLANES * _SUBLANES)
        budget = min(budget, half)
    tile = min(budget, n_rows)
    return tile, pl.cdiv(n_rows, tile)


def dropout_time_1d(x, p_drop, *, training, seed=0):
    """Forward pass of DropoutTime1D.  x: (B, T, H); returns same shape/dtype."""
    B, T, H = x.shape
    p_drop = float(p_drop)

    if not training:
        # Perf feedback: a dedicated Pallas kernel here costs a full extra HBM
        # read+write pass; leave the scalar scale to XLA so it fuses.
        return x * (1.0 - p_drop)

    total = B * T * H
    n_ts = B * T
    itemsize = x.dtype.itemsize
    seed_arr = jnp.asarray([seed], dtype=jnp.int32)

    # Path selection:
    #  * H % 128 == 0 (common case): (B*T, H) row view, one hash per timestep.
    #  * narrow H with lane-aligned total: lane-dense packed view, full-lane stores.
    #  * otherwise: row-view fallback (correct; stores are lane-masked).
    # TODO(synk): the "lane-dense prefix + small remainder" split for the rare
    # narrow-H, total % 128 != 0 case is not implemented.
    use_packed = (H % _LANES != 0) and (H < _LANES) and (total % _LANES == 0)

    if use_packed:
        n_rows, width = total // _LANES, _LANES
        row_tile, n_steps = _row_tiling(n_rows, width, itemsize)
        kernel = _make_packed_kernel(p_drop, H, row_tile)
    else:
        n_rows, width = n_ts, H
        row_tile, n_steps = _row_tiling(n_rows, width, itemsize)
        kernel = _make_rowwise_kernel(p_drop, row_tile)

    x2d = x.reshape(n_rows, width)
    y2d = pl.pallas_call(
        kernel,
        out_shape=jax.ShapeDtypeStruct((n_rows, width), x.dtype),
        grid_spec=pltpu.PrefetchScalarGridSpec(
            num_scalar_prefetch=1,
            grid=(n_steps,),
            in_specs=[pl.BlockSpec((row_tile, width), lambda i, seed_ref: (i, 0))],
            out_specs=pl.BlockSpec((row_tile, width), lambda i, seed_ref: (i, 0)),
        ),
        compiler_params=pltpu.CompilerParams(
            dimension_semantics=("parallel",),       # counter-based mask => order-free
        ),
        cost_estimate=pl.CostEstimate(
            flops=4 * total, transcendentals=0,
            bytes_accessed=2 * total * itemsize),
    )(seed_arr, x2d)
    return y2d.reshape(B, T, H)


if __name__ == "__main__":
    p_drop = 0.3
    key = jax.random.PRNGKey(0)
    k1, k2 = jax.random.split(key)

    # B x T x H, per the dense-captioning model (small demo shapes).
    x_narrow = jax.random.normal(k1, (2, 8, 32), dtype=jnp.float32)    # packed path
    x_wide = jax.random.normal(k2, (2, 64, 256), dtype=jnp.float32)    # row-wise path

    # --- eval mode: y = x * (1 - p_drop) ---
    y_eval = jax.block_until_ready(dropout_time_1d(x_narrow, p_drop, training=False))
    assert jnp.allclose(y_eval, x_narrow * (1.0 - p_drop), rtol=1e-6, atol=1e-6)

    # --- training mode: each timestep must be kept intact or zeroed as a whole ---
    def run_and_check(x, seed):
        y = jax.block_until_ready(dropout_time_1d(x, p_drop, training=True, seed=seed))
        b, t, h = x.shape
        yf = np.asarray(y).reshape(b * t, h)
        xf = np.asarray(x).reshape(b * t, h)
        kept = np.all(yf == xf, axis=-1)
        zeroed = np.all(yf == 0.0, axis=-1)
        assert np.all(kept | zeroed), "mask is not constant across a timestep"
        return kept

    run_and_check(x_narrow, seed=42)
    kept = run_and_check(x_wide, seed=7)
    # 128 timesteps at p=0.3: all-kept / all-dropped masks are (deterministically)
    # never produced by a reasonable hash, so this is a safe sanity check.
    assert kept.any() and (~kept).any(), "drop rate implausible"

    # bf16 runs natively through the same kernels.
    y_bf16 = jax.block_until_ready(
        dropout_time_1d(x_wide.astype(jnp.bfloat16), p_drop, training=True, seed=3))
    assert y_bf16.dtype == jnp.bfloat16

    # Determinism: same seed => identical mask.
    y1 = dropout_time_1d(x_wide, p_drop, training=True, seed=123)
    y2 = dropout_time_1d(x_wide, p_drop, training=True, seed=123)
    assert jnp.array_equal(jax.block_until_ready(y1), jax.block_until_ready(y2))

    print("KERNEL_OK")
</pallas_src>

<mosaic_0001>
module attributes {stable_mosaic.version = 11 : i64} {
  func.func @kernel(%arg0: i32, %arg1: memref<1xi32, #tpu.memory_space<smem>>, %arg2: memref<4x128xf32, #tpu.memory_space<vmem>>, %arg3: memref<4x128xf32, #tpu.memory_space<vmem>>) attributes {dimension_semantics = [#tpu.dimension_semantics<parallel>], iteration_bounds = array<i64: 1>, scalar_prefetch = 1 : i64, scratch_operands = 0 : i64, tpu.core_type = #tpu.core_type<tc>, window_params = [{transform_indices = @transform_0, window_bounds = array<i64: 4, 128>}, {transform_indices = @transform_1, window_bounds = array<i64: 4, 128>}]} {
    %0 = tpu.iota {dimensions = array<i32: 0>} : vector<4x128xi32>
    %1 = tpu.iota {dimensions = array<i32: 1>} : vector<4x128xi32>
    %c4_i32 = arith.constant 4 : i32
    %2 = arith.muli %arg0, %c4_i32 : i32
    %3 = vector.broadcast %2 : i32 to vector<4x128xi32>
    %4 = arith.addi %3, %0 : vector<4x128xi32>
    %c5_i32 = arith.constant 5 : i32
    %5 = vector.broadcast %c5_i32 : i32 to vector<4x128xi32>
    %6 = arith.shrsi %4, %5 : vector<4x128xi32>
    %c31_i32 = arith.constant 31 : i32
    %7 = vector.broadcast %c31_i32 : i32 to vector<4x128xi32>
    %8 = arith.andi %4, %7 : vector<4x128xi32>
    %c128_i32 = arith.constant 128 : i32
    %9 = vector.broadcast %c128_i32 : i32 to vector<4x128xi32>
    %10 = arith.muli %6, %9 : vector<4x128xi32>
    %c128_i32_0 = arith.constant 128 : i32
    %11 = vector.broadcast %c128_i32_0 : i32 to vector<4x128xi32>
    %12 = arith.muli %8, %11 : vector<4x128xi32>
    %13 = arith.addi %12, %1 : vector<4x128xi32>
    %c5_i32_1 = arith.constant 5 : i32
    %14 = vector.broadcast %c5_i32_1 : i32 to vector<4x128xi32>
    %15 = arith.shrsi %13, %14 : vector<4x128xi32>
    %16 = arith.addi %10, %15 : vector<4x128xi32>
    %c0 = arith.constant 0 : index
    %17 = memref.load %arg1[%c0] : memref<1xi32, #tpu.memory_space<smem>>
    %c668265263_i32 = arith.constant 668265263 : i32
    %18 = arith.muli %17, %c668265263_i32 : i32
    %19 = vector.broadcast %18 : i32 to vector<4x128xi32>
    %20 = arith.addi %16, %19 : vector<4x128xi32>
    %c16_i32 = arith.constant 16 : i32
    %21 = vector.broadcast %c16_i32 : i32 to vector<4x128xi32>
    %22 = arith.shrsi %20, %21 : vector<4x128xi32>
    %c65535_i32 = arith.constant 65535 : i32
    %23 = vector.broadcast %c65535_i32 : i32 to vector<4x128xi32>
    %24 = arith.andi %22, %23 : vector<4x128xi32>
    %25 = arith.xori %20, %24 : vector<4x128xi32>
    %c2146121005_i32 = arith.constant 2146121005 : i32
    %26 = vector.broadcast %c2146121005_i32 : i32 to vector<4x128xi32>
    %27 = arith.muli %25, %26 : vector<4x128xi32>
    %c15_i32 = arith.constant 15 : i32
    %28 = vector.broadcast %c15_i32 : i32 to vector<4x128xi32>
    %29 = arith.shrsi %27, %28 : vector<4x128xi32>
    %c131071_i32 = arith.constant 131071 : i32
    %30 = vector.broadcast %c131071_i32 : i32 to vector<4x128xi32>
    %31 = arith.andi %29, %30 : vector<4x128xi32>
    %32 = arith.xori %27, %31 : vector<4x128xi32>
    %c-2073254261_i32 = arith.constant -2073254261 : i32
    %33 = vector.broadcast %c-2073254261_i32 : i32 to vector<4x128xi32>
    %34 = arith.muli %32, %33 : vector<4x128xi32>
    %c16_i32_2 = arith.constant 16 : i32
    %35 = vector.broadcast %c16_i32_2 : i32 to vector<4x128xi32>
    %36 = arith.shrsi %34, %35 : vector<4x128xi32>
    %c65535_i32_3 = arith.constant 65535 : i32
    %37 = vector.broadcast %c65535_i32_3 : i32 to vector<4x128xi32>
    %38 = arith.andi %36, %37 : vector<4x128xi32>
    %39 = arith.xori %34, %38 : vector<4x128xi32>
    %c-858993460_i32 = arith.constant -858993460 : i32
    %40 = vector.broadcast %c-858993460_i32 : i32 to vector<4x128xi32>
    %41 = arith.cmpi sgt, %39, %40 : vector<4x128xi32>
    %c0_4 = arith.constant 0 : index
    %c0_5 = arith.constant 0 : index
    %42 = vector.load %arg2[%c0_4, %c0_5] : memref<4x128xf32, #tpu.memory_space<vmem>>, vector<4x128xf32>
    %cst = arith.constant 0.000000e+00 : f32
    %43 = vector.broadcast %cst : f32 to vector<4x128xf32>
    %44 = arith.select %41, %42, %43 : vector<4x128xi1>, vector<4x128xf32>
    %c0_6 = arith.constant 0 : index
    %c0_7 = arith.constant 0 : index
    %45 = vector.load %arg3[%c0_6, %c0_7] : memref<4x128xf32, #tpu.memory_space<vmem>>, vector<4x128xf32>
    tpu.vector_store %arg3[%c0_6, %c0_7], %44 {strides = array<i32>} : memref<4x128xf32, #tpu.memory_space<vmem>>, vector<4x128xf32>,
    return
  }
  func.func @transform_0(%arg0: i32, %arg1: memref<1xi32, #tpu.memory_space<smem>>) -> (i32, i32) {
    %c0_i32 = arith.constant 0 : i32
    %c0_i32_0 = arith.constant 0 : i32
    return %arg0, %c0_i32 : i32, i32
  }
  func.func @transform_1(%arg0: i32, %arg1: memref<1xi32, #tpu.memory_space<smem>>) -> (i32, i32) {
    %c0_i32 = arith.constant 0 : i32
    %c0_i32_0 = arith.constant 0 : i32
    return %arg0, %c0_i32 : i32, i32
  }
}

</mosaic_0001>

<bundles_post_ra>
// kernel: tpu_custom_call.1
= control target key start
LH: loop header
LB: loop body
LE: loop exit
PB: predicated region body
PF: predicated region fallthrough
CT: control target
= control target key end

     0   :  { %8 = vsyncpa [#allocation5], 0  ;;  %s158_s0 = inlined_call_operand.<no memory space> [shape: s32[1], index: 0, kind: input, shape index: {}]   ;;  %s159_s1 = inlined_call_operand.hbm [shape: f32[4,128], index: 1, kind: input, shape index: {}]   ;;  %s160_s2 = inlined_call_operand.hbm [shape: f32[4,128], index: 2, kind: output, shape index: {}]  }
   0x1   :  { %9 = vsyncpa [#allocation6], 0  ;;  %s15_s11 = sshll.u32 %s159_s1, 4  ;;  %s132_s12 = smov [#allocation4]   ;;  %s16_s11 = int_to_ptr.hbm [resolvable:$true] %s15_s11 }
   0x2   :  { %s17_s13 = sshll.u32 %s132_s12, 4  ;;  %s18_s13 = int_to_ptr.vmem [resolvable:$true] %s17_s13 }
   0x3   :  { %20 = dma.hbm_to_vmem [thread:$0]  %s16_s11, 64, %s18_s13, [#allocation5]  }
   0x4   :  { %128 = dma.done.wait [#allocation5], 64  }
   0x5   :  { %129 = vsyncadd [#allocation5], 4294967232  ;;  %v25_v0 = vlaneseq  ;;  %s40_s16 = smul.u32 668265263, %s158_s0  ;;  %s133_s1 = smov [#allocation7]  }
   0x6   :  { %s63_s17 = sshll.u32 %s133_s1, 4  ;;  %s65_s20 = sshll.u32 %s160_s2, 4  ;;  %v55_v20 = vld [vmem:[#allocation4] sm:$0xf]  ;;  %s64_s17 = int_to_ptr.vmem [resolvable:$true] %s63_s17  ;;  %s66_s20 = int_to_ptr.hbm [resolvable:$true] %s65_s20 }
   0x7   :  { %v26_v1 = vshrl.u32 %v25_v0, 7  ;;  %v28_v2 = vand.u32 127, %v25_v0  ;;  %v41_v9 = vstv %s40_s16 }
   0x9   :  { %v32_v3 = vshra.s32 %v26_v1, 5  ;;  %v33_v4 = vand.u32 31, %v26_v1 }
   0xb   :  { %v35_v5 = vmul.u32 128, %v33_v4  ;;  %v34_v6 = vmul.u32 128, %v32_v3 }
   0xd   :  { %v36_v7 = vadd.s32 %v35_v5, %v28_v2 }
   0xf   :  { %v37_v8 = vshra.s32 %v36_v7, 5 }
  0x11   :  { %v38_v10 = vadd.s32 %v37_v8, %v34_v6 }
  0x13   :  { %v42_v11 = vadd.s32 %v41_v9, %v38_v10 }
  0x15   :  { %v75_v12 = vshrl.u32 %v42_v11, 16 }
  0x17   :  { %v45_v13 = vxor.u32 %v75_v12, %v42_v11 }
  0x19   :  { %v46_v14 = vmul.u32 2146121005, %v45_v13 }
  0x1b   :  { %v76_v15 = vshrl.u32 %v46_v14, 15 }
  0x1d   :  { %v49_v16 = vxor.u32 %v76_v15, %v46_v14 }
  0x1f   :  { %v50_v17 = vmul.u32 2221713035, %v49_v16 }
  0x21   :  { %v77_v18 = vshrl.u32 %v50_v17, 16 }
  0x23   :  { %v53_v19 = vxor.u32 %v77_v18, %v50_v17 }
  0x25   :  { %vm54_vm0 = vcmp.gt.s32.totalorder %v53_v19, 3435973836 }
  0x26   :  { %v56_v21 = vsel %vm54_vm0, %v55_v20, 0.0 }
  0x27   :  { %57 = vst [vmem:[#allocation7] sm:$0xf] %v56_v21 }
  0x28   :  { %68 = dma.vmem_to_hbm [thread:$0]  %s64_s17, 64, %s66_s20, [#allocation6]  }
  0x29   :  { %130 = dma.done.wait [#allocation6], 64  }
  0x2a   :  { %131 = vsyncadd [#allocation6], 4294967232 }
  0x2b   :  { %73 = vsyncpa [#allocation5], 1 }
  0x2c   :  { %74 = vsyncpa [#allocation6], 1 }

</bundles_post_ra>
